<compile_context>
chip_gen: v5e
topology: v5e:2x2
jax: 0.10.0
libtpu: 0.0.40
codegen_flags: <defaults>
</compile_context>

<pallas_src>
import jax
import jax.numpy as jnp
from jax.experimental import pallas as pl
from jax.experimental.pallas import tpu as pltpu


# --------------------------------------------------------------------------- kernels

def _project_kernel(x_ref, cx_ref, wg_ref, xw_ref):
    """xw_ref[tile] = [ x_tile @ W_gcn | cx_tile @ W_gcn ]  -> (TM, 2*OUT)."""
    out = wg_ref.shape[1]
    xw_ref[:, :out] = jnp.dot(x_ref[...], wg_ref[...],
                              preferred_element_type=jnp.float32)
    xw_ref[:, out:] = jnp.dot(cx_ref[...], wg_ref[...],
                              preferred_element_type=jnp.float32)


def _aggregate_kernel(adj_ref, xw_ref, b_ref, feats_ref):
    """feats_ref[tile] = adj_tile @ xw_all + b   (both branches at once)."""
    feats_ref[...] = (
        jnp.dot(adj_ref[...], xw_ref[...], preferred_element_type=jnp.float32)
        + b_ref[...])


def _readout_disc_kernel(feats_ref, wd_ref, h_ref):
    """Readout (mean+sigmoid over the positive branch) + bilinear discriminator."""
    n = feats_ref.shape[0]
    out = wd_ref.shape[0]
    f = feats_ref[...]

    # Readout: XLU sublane reduce over rows (positive half only) + EUP sigmoid.
    c = jax.nn.sigmoid(jnp.sum(f[:, :out], axis=0, keepdims=True) * (1.0 / n))  # (1, OUT)

    # Discriminator rewritten as a matvec: h = feats @ (W_disc @ c^T).
    v = jnp.dot(wd_ref[...], c.T, preferred_element_type=jnp.float32)           # (OUT, 1)
    h1 = jnp.dot(f[:, :out], v, preferred_element_type=jnp.float32)             # (N, 1)
    h2 = jnp.dot(f[:, out:], v, preferred_element_type=jnp.float32)             # (N, 1)

    # Lane-dense (2, N) output; wrapper reshape reproduces torch.cat((h1, h2), 0).
    h_ref[0:1, :] = h1.T
    h_ref[1:2, :] = h2.T


# --------------------------------------------------------------------------- wrapper

def _pick_tile_m(n, row_bytes, vmem_budget=24 * 2 ** 20, cap=512):
    """Largest row tile that divides n, is sublane-aligned, and whose double-buffered
    adjacency tile fits a VMEM budget that is safe on v5e/v6e/v7x."""
    for tm in range(min(n, cap), 7, -1):
        if n % tm == 0 and tm % 8 == 0 and 2 * tm * row_bytes <= vmem_budget:
            return tm
    return n  # tiny graphs: single untiled block


def deep_graph_infomax(feats, c_feats, adj, w_gcn, b_gcn, w_disc, *, tile_m=None):
    n, in_feats = feats.shape
    out_feats = w_gcn.shape[1]
    itemsize = adj.dtype.itemsize

    if tile_m is None:
        tile_m = _pick_tile_m(n, n * itemsize)
    assert n % tile_m == 0, (n, tile_m)
    grid = (n // tile_m,)

    # Bias duplicated for the lane-stacked [positive | corrupted] branches.
    b_wide = jnp.concatenate([b_gcn, b_gcn], axis=1)                      # (1, 2*OUT)

    # ---- Pass A: per-row-tile feature projection into one stacked (N, 2*OUT) array.
    xw_all = pl.pallas_call(
        _project_kernel,
        out_shape=jax.ShapeDtypeStruct((n, 2 * out_feats), jnp.float32),
        grid=grid,
        in_specs=[pl.BlockSpec((tile_m, in_feats), lambda i: (i, 0)),
                  pl.BlockSpec((tile_m, in_feats), lambda i: (i, 0)),
                  pl.BlockSpec((in_feats, out_feats), lambda i: (0, 0))],
        out_specs=pl.BlockSpec((tile_m, 2 * out_feats), lambda i: (i, 0)),
        compiler_params=pltpu.CompilerParams(
            dimension_semantics=("parallel",)),
    )(feats, c_feats, w_gcn)

    # ---- Pass B: heavy adjacency pass, row-tiled + double-buffered, 'parallel' axis.
    vmem_needed = (2 * tile_m * n * itemsize                # adj tiles (double-buffered)
                   + 2 * n * 2 * out_feats * 4              # stacked xw (revisited block)
                   + 2 * tile_m * 2 * out_feats * 4         # output tiles
                   + 2 * 2 * out_feats * 4)                 # bias
    # Never below the 32 MiB default; never above a v7x-safe 48 MiB ceiling.
    vmem_limit = int(min(48 * 2 ** 20, max(32 * 2 ** 20, 2 * vmem_needed)))
    flops_b = 2 * n * n * (2 * out_feats)
    bytes_b = n * n * itemsize + 2 * (n * 2 * out_feats * 4) + 2 * out_feats * 4

    feats_all = pl.pallas_call(
        _aggregate_kernel,
        out_shape=jax.ShapeDtypeStruct((n, 2 * out_feats), jnp.float32),
        grid=grid,
        in_specs=[pl.BlockSpec((tile_m, n), lambda i: (i, 0)),
                  pl.BlockSpec((n, 2 * out_feats), lambda i: (0, 0)),
                  pl.BlockSpec((1, 2 * out_feats), lambda i: (0, 0))],
        out_specs=pl.BlockSpec((tile_m, 2 * out_feats), lambda i: (i, 0)),
        compiler_params=pltpu.CompilerParams(
            dimension_semantics=("parallel",),
            vmem_limit_bytes=vmem_limit),
        cost_estimate=pl.CostEstimate(flops=flops_b, transcendentals=0,
                                      bytes_accessed=bytes_b),
    )(adj, xw_all, b_wide)

    # ---- Pass C: tiny readout + discriminator epilogue (single VMEM block).
    # TODO(synk): tile this pass too once (N, 2*OUT) no longer fits a single VMEM block.
    h_rows = pl.pallas_call(
        _readout_disc_kernel,
        out_shape=jax.ShapeDtypeStruct((2, n), jnp.float32),
        in_specs=[pl.BlockSpec(memory_space=pltpu.MemorySpace.VMEM)] * 2,
        out_specs=pl.BlockSpec(memory_space=pltpu.MemorySpace.VMEM),
        cost_estimate=pl.CostEstimate(
            flops=2 * n * 2 * out_feats + 2 * out_feats * out_feats + n * out_feats,
            transcendentals=out_feats,
            bytes_accessed=(n * 2 * out_feats * 4 + out_feats * out_feats * 4
                            + 2 * n * 4)),
    )(feats_all, w_disc)

    # (2, N) row-major  ->  (2N, 1)  ==  torch.cat((h1, h2), 0)
    return h_rows.reshape(2 * n, 1)


# --------------------------------------------------------------------------- reference

def reference(feats, c_feats, adj, w_gcn, b_gcn, w_disc):
    f1 = adj @ (feats @ w_gcn) + b_gcn
    c = jax.nn.sigmoid(jnp.mean(f1, axis=0, keepdims=True))
    f2 = adj @ (c_feats @ w_gcn) + b_gcn
    h1 = jnp.sum((f1 @ w_disc) * c, axis=-1, keepdims=True)
    h2 = jnp.sum((f2 @ w_disc) * c, axis=-1, keepdims=True)
    return jnp.concatenate([h1, h2], axis=0)


if __name__ == "__main__":
    N, FEATS, OUT_FEATS = 128, 16, 32

    key = jax.random.PRNGKey(0)
    k_feats, k_cfeats, k_adj, k_wg, k_bg, k_wd = jax.random.split(key, 6)

    feats = jax.random.normal(k_feats, (N, FEATS), dtype=jnp.float32)
    c_feats = jax.random.normal(k_cfeats, (N, FEATS), dtype=jnp.float32)
    # symmetric-ish, row-normalized dense adjacency with self loops
    a = jax.random.uniform(k_adj, (N, N), dtype=jnp.float32)
    adj = (a + a.T) / 2.0 + jnp.eye(N, dtype=jnp.float32)
    adj = adj / jnp.sum(adj, axis=1, keepdims=True)

    # Parameter shapes per __init__:
    #   GraphConvolutionLayer(feats, out_feats): W (FEATS, OUT), b (1, OUT)
    #   Discriminator(out_feats, out_feats):     W (OUT, OUT)
    w_gcn = jax.random.normal(k_wg, (FEATS, OUT_FEATS), dtype=jnp.float32) * 0.1
    b_gcn = jax.random.normal(k_bg, (1, OUT_FEATS), dtype=jnp.float32) * 0.1
    w_disc = jax.random.normal(k_wd, (OUT_FEATS, OUT_FEATS), dtype=jnp.float32) * 0.1

    # tile_m=64 so the demo actually exercises the multi-step, double-buffered grid.
    out = deep_graph_infomax(feats, c_feats, adj, w_gcn, b_gcn, w_disc, tile_m=64)
    out = jax.block_until_ready(out)

    ref = reference(feats, c_feats, adj, w_gcn, b_gcn, w_disc)
    assert out.shape == (2 * N, 1)
    assert jnp.allclose(out, ref, atol=1e-4, rtol=1e-4)

    print("KERNEL_OK")
</pallas_src>

<mosaic_0001>
module attributes {stable_mosaic.version = 11 : i64} {
  func.func @_project_kernel(%arg0: i32, %arg1: memref<64x16xf32, #tpu.memory_space<vmem>>, %arg2: memref<64x16xf32, #tpu.memory_space<vmem>>, %arg3: memref<16x32xf32, #tpu.memory_space<vmem>>, %arg4: memref<64x64xf32, #tpu.memory_space<vmem>>) attributes {dimension_semantics = [#tpu.dimension_semantics<parallel>], iteration_bounds = array<i64: 2>, scalar_prefetch = 0 : i64, scratch_operands = 0 : i64, tpu.core_type = #tpu.core_type<tc>, window_params = [{transform_indices = @transform_0, window_bounds = array<i64: 64, 16>}, {transform_indices = @transform_1, window_bounds = array<i64: 64, 16>}, {pipeline_mode = #tpu.pipeline_mode<synchronous>, transform_indices = @transform_2, window_bounds = array<i64: 16, 32>}, {transform_indices = @transform_3, window_bounds = array<i64: 64, 64>}]} {
    %c0 = arith.constant 0 : index
    %c0_0 = arith.constant 0 : index
    %0 = vector.load %arg1[%c0, %c0_0] : memref<64x16xf32, #tpu.memory_space<vmem>>, vector<64x16xf32>
    %c0_1 = arith.constant 0 : index
    %c0_2 = arith.constant 0 : index
    %1 = vector.load %arg3[%c0_1, %c0_2] : memref<16x32xf32, #tpu.memory_space<vmem>>, vector<16x32xf32>
    %cst = arith.constant dense<0.000000e+00> : vector<64x32xf32>
    %2 = tpu.matmul %0, %1, %cst {dimension_numbers = #tpu.dot_dimension_numbers<[1], [0], [0], [1], [0, 0, 1, 1], [], []>} : vector<64x16xf32>, vector<16x32xf32>, vector<64x32xf32> -> vector<64x32xf32>
    %c0_3 = arith.constant 0 : index
    %c0_4 = arith.constant 0 : index
    %3 = vector.load %arg4[%c0_3, %c0_4] : memref<64x64xf32, #tpu.memory_space<vmem>>, vector<64x32xf32>
    tpu.vector_store %arg4[%c0_3, %c0_4], %2 {strides = array<i32>} : memref<64x64xf32, #tpu.memory_space<vmem>>, vector<64x32xf32>,
    %c0_5 = arith.constant 0 : index
    %c0_6 = arith.constant 0 : index
    %4 = vector.load %arg2[%c0_5, %c0_6] : memref<64x16xf32, #tpu.memory_space<vmem>>, vector<64x16xf32>
    %c0_7 = arith.constant 0 : index
    %c0_8 = arith.constant 0 : index
    %5 = vector.load %arg3[%c0_7, %c0_8] : memref<16x32xf32, #tpu.memory_space<vmem>>, vector<16x32xf32>
    %cst_9 = arith.constant dense<0.000000e+00> : vector<64x32xf32>
    %6 = tpu.matmul %4, %5, %cst_9 {dimension_numbers = #tpu.dot_dimension_numbers<[1], [0], [0], [1], [0, 0, 1, 1], [], []>} : vector<64x16xf32>, vector<16x32xf32>, vector<64x32xf32> -> vector<64x32xf32>
    %c0_10 = arith.constant 0 : index
    %c32 = arith.constant 32 : index
    %7 = vector.load %arg4[%c0_10, %c32] : memref<64x64xf32, #tpu.memory_space<vmem>>, vector<64x32xf32>
    tpu.vector_store %arg4[%c0_10, %c32], %6 {strides = array<i32>} : memref<64x64xf32, #tpu.memory_space<vmem>>, vector<64x32xf32>,
    return
  }
  func.func @transform_0(%arg0: i32) -> (i32, i32) {
    %c0_i32 = arith.constant 0 : i32
    %c0_i32_0 = arith.constant 0 : i32
    return %arg0, %c0_i32 : i32, i32
  }
  func.func @transform_1(%arg0: i32) -> (i32, i32) {
    %c0_i32 = arith.constant 0 : i32
    %c0_i32_0 = arith.constant 0 : i32
    return %arg0, %c0_i32 : i32, i32
  }
  func.func @transform_2(%arg0: i32) -> (i32, i32) {
    %c0_i32 = arith.constant 0 : i32
    %c0_i32_0 = arith.constant 0 : i32
    %c0_i32_1 = arith.constant 0 : i32
    return %c0_i32, %c0_i32_0 : i32, i32
  }
  func.func @transform_3(%arg0: i32) -> (i32, i32) {
    %c0_i32 = arith.constant 0 : i32
    %c0_i32_0 = arith.constant 0 : i32
    return %arg0, %c0_i32 : i32, i32
  }
}

</mosaic_0001>

<bundles_post_ra>
// kernel: tpu_custom_call.1
= control target key start
LH: loop header
LB: loop body
LE: loop exit
PB: predicated region body
PF: predicated region fallthrough
CT: control target
= control target key end

     0   :  { %s536_s12 = smov 0   ;;  %s617_s0 = inlined_call_operand.vmem [shape: f32[128,16], index: 0, kind: input, shape index: {}]   ;;  %s618_s1 = inlined_call_operand.vmem [shape: f32[128,16], index: 1, kind: input, shape index: {}]   ;;  %s619_s2 = inlined_call_operand.vmem [shape: f32[16,32], index: 2, kind: input, shape index: {}]   ;;  %s620_s3 = inlined_call_operand.vmem [shape: f32[128,64], index: 3, kind: output, shape index: {}]  }
   0x1 LB: > { %s465_s13 = sadd.s32 4294967295, %s513_s12   ;;  %p469_p0 = scmp.ge.s32.totalorder %s513_s12, 1  ;;  %s513_s12 = sphi %s536_s12, %s13_s12  }
   0x2   : > { %p149_p1 = scmp.lt.s32.totalorder %s513_s12, 3 }
   0x4   : > { %p150_p2 = pnand %p469_p0, %p149_p1 }
   0x5   : > { %s470_s18 = sshll.u32 (!%p150_p2), %s465_s13, 3  ;;  %s515_s26 = smov (!%p150_p2), 32  }
   0x6   : > { %153 = sbr.rel (%p150_p2) target bundleno = 290 (0x122), region = 32  ;;  %p179_p3 = scmp.lt.s32.totalorder (!%p150_p2), %s470_s18, 15 }
   0xb   : > { %v290_v0 = vld [vmem:[%s619_s2 + $0x8] sm:$0xff]  ;;  %v289_v1 = vld [vmem:[%s619_s2] sm:$0xff]  ;;  %s622_s18 = smov (!%p179_p3, %s470_s18), 15  ;;  %vm206_vm0 = vcmask 130048   ;;  %vm272_vm1 = vcmask 261120   ;;  %vm388_vm2 = vcmask 523520  }
   0xc   : > { %329 = vmatpush.msra.mxu1 %v290_v0  ;;  %496 = vmatpush.msra.mxu3 %v290_v0  ;;  %s550_s19 = sshll.u32 %s622_s18, 3 }
   0xd   : > { %494 = vmatpush.msra.mxu2 %v290_v0  ;;  %245 = vmatpush.msra.mxu0 %v290_v0  ;;  %s188_s22 = scalar_lea.vmem %s618_s1, %s550_s19  ;;  %s182_s25 = scalar_lea.vmem %s617_s0, %s550_s19 }
   0xe   : > { %330 = vmatpush.msra.mxu1 %v289_v1  ;;  %497 = vmatpush.msra.mxu3 %v289_v1  ;;  %v281_v2 = vld [vmem:[%s188_s22] sm:$0xff]  ;;  %v282_v6 = vld [vmem:[%s188_s22 + $0x8] sm:$0xff]  ;;  %v283_v10 = vld [vmem:[%s188_s22 + $0x10] sm:$0xff]  ;;  %s580_s29 = scalar_lea.vmem %s620_s3, %s550_s19 }
   0xf   : > { %495 = vmatpush.msra.mxu2 %v289_v1  ;;  %246 = vmatpush.msra.mxu0 %v289_v1  ;;  %v285_v3 = vld [vmem:[%s188_s22 + $0x20] sm:$0xff]  ;;  %v286_v7 = vld [vmem:[%s188_s22 + $0x28] sm:$0xff]  ;;  %v287_v11 = vld [vmem:[%s188_s22 + $0x30] sm:$0xff] }
  0x10   : > { %484 = vmatmul.msk.f32.vlgmr.msra.gmra.mxu1 %vm206_vm0, %v281_v2  ;;  %488 = vmatmul.msk.f32.vlgmr.msra.gmra.mxu3 %vm206_vm0, %v285_v3  ;;  %v200_v4 = vld [vmem:[%s182_s25 + $0x20] sm:$0xff]  ;;  %v201_v8 = vld [vmem:[%s182_s25 + $0x28] sm:$0xff]  ;;  %v284_v12 = vld [vmem:[%s188_s22 + $0x18] sm:$0xff] }
  0x11   : > { %480 = vmatmul.msk.f32.vlgmr.msra.gmra.mxu2 %vm206_vm0, %v200_v4  ;;  %v196_v5 = vld [vmem:[%s182_s25] sm:$0xff]  ;;  %v197_v9 = vld [vmem:[%s182_s25 + $0x8] sm:$0xff]  ;;  %v288_v13 = vld [vmem:[%s188_s22 + $0x38] sm:$0xff] }
  0x12   : > { %476 = vmatmul.msk.f32.vlgmr.msra.gmra.mxu0 %vm206_vm0, %v196_v5  ;;  %v198_v14 = vld [vmem:[%s182_s25 + $0x10] sm:$0xff]  ;;  %v199_v16 = vld [vmem:[%s182_s25 + $0x18] sm:$0xff] }
  0x13   : > { %v202_v15 = vld [vmem:[%s182_s25 + $0x30] sm:$0xff]  ;;  %v203_v17 = vld [vmem:[%s182_s25 + $0x38] sm:$0xff] }
  0x18   : > { %485 = vmatmul.msk.f32.gmra.mxu1 %vm206_vm0, %v282_v6  ;;  %489 = vmatmul.msk.f32.gmra.mxu3 %vm206_vm0, %v286_v7 }
  0x19   : > { %481 = vmatmul.msk.f32.gmra.mxu2 %vm206_vm0, %v201_v8 }
  0x1a   : > { %477 = vmatmul.msk.f32.gmra.mxu0 %vm206_vm0, %v197_v9 }
  0x20   : > { %486 = vmatmul.msk.f32.gmra.mxu1 %vm206_vm0, %v283_v10  ;;  %490 = vmatmul.msk.f32.gmra.mxu3 %vm206_vm0, %v287_v11 }
  0x21   : > { %482 = vmatmul.msk.f32.gmra.mxu2 %vm206_vm0, %v202_v15 }
  0x22   : > { %478 = vmatmul.msk.f32.gmra.mxu0 %vm206_vm0, %v198_v14 }
  0x28   : > { %487 = vmatmul.msk.f32.gmra.mxu1 %vm206_vm0, %v284_v12  ;;  %491 = vmatmul.msk.f32.gmra.mxu3 %vm206_vm0, %v288_v13 }
  0x29   : > { %483 = vmatmul.msk.f32.gmra.mxu2 %vm206_vm0, %v203_v17 }
  0x2a   : > { %479 = vmatmul.msk.f32.gmra.mxu0 %vm206_vm0, %v199_v16 }
  0x8d   : > { %v332_v18 = vpop.f32.mrf.mxu1 }
  0x8e   : > { %364 = vrot.lane.b32.xlu0 %v332_v18, %s515_s26 }
  0x8f   : > { %v248_v28 = vpop.f32.mrf.mxu0 }
  0x90   : > { %273 = vst.msk [vmem:[%s580_s29] sm:$0xff] %vm272_vm1, %v248_v28 }
  0x93   : > { %v344_v19 = vpop.f32.mrf.mxu3 }
  0x94   : > { %372 = vrot.lane.b32.xlu2 %v344_v19, %s515_s26  ;;  %v260_v21 = vpop.f32.mrf.mxu2 }
  0x95   : > { %v335_v20 = vpop.f32.mrf.mxu1  ;;  %277 = vst.msk [vmem:[%s580_s29 + $0x20] sm:$0xff] %vm272_vm1, %v260_v21 }
  0x96   : > { %366 = vrot.lane.b32.xlu0 %v335_v20, %s515_s26 }
  0x97   : > { %v251_v29 = vpop.f32.mrf.mxu0 }
  0x98   : > { %274 = vst.msk [vmem:[%s580_s29 + $0x8] sm:$0xff] %vm272_vm1, %v251_v29 }
  0x9b   : > { %v347_v22 = vpop.f32.mrf.mxu3 }
  0x9c   : > { %374 = vrot.lane.b32.xlu2 %v347_v22, %s515_s26  ;;  %v263_v27 = vpop.f32.mrf.mxu2 }
  0x9d   : > { %v338_v23 = vpop.f32.mrf.mxu1  ;;  %278 = vst.msk [vmem:[%s580_s29 + $0x28] sm:$0xff] %vm272_vm1, %v263_v27 }
  0x9e   : > { %368 = vrot.lane.b32.xlu1 %v338_v23, %s515_s26 }
  0x9f   : > { %v254_v30 = vpop.f32.mrf.mxu0 }
  0xa0   : > { %275 = vst.msk [vmem:[%s580_s29 + $0x10] sm:$0xff] %vm272_vm1, %v254_v30 }
  0xa3   : > { %v350_v24 = vpop.f32.mrf.mxu3 }
  0xa4   : > { %376 = vrot.lane.b32.xlu0 %v350_v24, %s515_s26  ;;  %v266_v32 = vpop.f32.mrf.mxu2 }
  0xa5   : > { %v341_v25 = vpop.f32.mrf.mxu1  ;;  %279 = vst.msk [vmem:[%s580_s29 + $0x30] sm:$0xff] %vm272_vm1, %v266_v32 }
  0xa6   : > { %370 = vrot.lane.b32.xlu1 %v341_v25, %s515_s26 }
  0xa7   : > { %v257_v33 = vpop.f32.mrf.mxu0 }
  0xa8   : > { %276 = vst.msk [vmem:[%s580_s29 + $0x18] sm:$0xff] %vm272_vm1, %v257_v33 }
  0xab   : > { %v353_v26 = vpop.f32.mrf.mxu3 }
  0xac   : > { %v269_v35 = vpop.f32.mrf.mxu2 }
  0xad   : > { %280 = vst.msk [vmem:[%s580_s29 + $0x38] sm:$0xff] %vm272_vm1, %v269_v35 }
  0xae   : > { %378 = vrot.lane.b32.xlu1 %v353_v26, %s515_s26 }
  0xee   : > { %v373_v31 = vpop.permute.xlu2 %372 }
  0xef   : > { %393 = vst.msk [vmem:[%s580_s29 + $0x20] sm:$0xff] %vm388_vm2, %v373_v31 }
  0xf6   : > { %v375_v34 = vpop.permute.xlu2 %374 }
  0xf7   : > { %394 = vst.msk [vmem:[%s580_s29 + $0x28] sm:$0xff] %vm388_vm2, %v375_v34 }
 0x100   : > { %v365_v36 = vpop.permute.xlu0 %364 }
 0x101   : > { %389 = vst.msk [vmem:[%s580_s29] sm:$0xff] %vm388_vm2, %v365_v36 }
 0x108   : > { %v367_v37 = vpop.permute.xlu0 %366 }
 0x109   : > { %390 = vst.msk [vmem:[%s580_s29 + $0x8] sm:$0xff] %vm388_vm2, %v367_v37 }
 0x110   : > { %v369_v38 = vpop.permute.xlu1 %368 }
 0x111   : > { %391 = vst.msk [vmem:[%s580_s29 + $0x10] sm:$0xff] %vm388_vm2, %v369_v38 }
 0x116   : > { %v377_v39 = vpop.permute.xlu0 %376 }
 0x117   : > { %395 = vst.msk [vmem:[%s580_s29 + $0x30] sm:$0xff] %vm388_vm2, %v377_v39 }
 0x118   : > { %v371_v40 = vpop.permute.xlu1 %370 }
 0x119   : > { %392 = vst.msk [vmem:[%s580_s29 + $0x18] sm:$0xff] %vm388_vm2, %v371_v40 }
 0x120   : > { %v379_v41 = vpop.permute.xlu1 %378 }
 0x121   : > { %396 = vst.msk [vmem:[%s580_s29 + $0x38] sm:$0xff] %vm388_vm2, %v379_v41 }
 0x122 PF: > { %s13_s12 = sadd.s32 1, %s513_s12  }
 0x123   : > { %p10_p4 = scmp.ge.s32.totalorder %s13_s12, 4  }
 0x125   :  { %12 = sbr.rel (!%p10_p4) target bundleno = 1 (0x1), region = 65 }

</bundles_post_ra>
